<compile_context>
chip_gen: v7x
topology: tpu7x:2x2x1
jax: 0.10.0
libtpu: 0.0.40
codegen_flags: <defaults>
</compile_context>

<pallas_src>
import jax
import jax.numpy as jnp
from jax.experimental import pallas as pl
from jax.experimental.pallas import tpu as pltpu

IN_DIM = 28 * 28          # 784 logical input features (also the stored K of W1)
HIDDEN = 200              # logical hidden width (no 200->10 head, matching torch)
HID_PAD = 256             # 200 padded to a lane multiple (2 * 128)
N_LAYERS = 4

MAX_BATCH_TILE = 1024     # ~7 MiB resident set -> fits v5e's 16 MiB scoped VMEM


def _round_up(n, m):
    return ((n + m - 1) // m) * m


def _cdiv(a, b):
    return -(-a // b)


def _choose_batch_tile(batch, max_tile=MAX_BATCH_TILE):
    """Tile rows: <= max_tile, multiple of 8, >=2 grid steps once B is big
    enough (v7x has 2 TensorCores), and sized from B so padding waste < 8 rows
    per step."""
    steps = max(_cdiv(batch, max_tile), 2 if batch >= 64 else 1)
    tb = min(_round_up(_cdiv(batch, steps), 8), max_tile)
    return max(tb, 8)


def _mlp_kernel(x_ref,
                w1_ref, b1_ref, w2_ref, b2_ref,
                w3_ref, b3_ref, w4_ref, b4_ref,
                o_ref, h_ref):
    """Fused 4x (Linear + ReLU).

    x_ref : (tb, 784)  f32/bf16      w1_ref : (784, 256) bf16
    w2..4 : (256, 256) bf16          b*_ref : (1, 256)   f32
    o_ref : (tb, 256)  f32           h_ref  : VMEM scratch (tb, 256) bf16

    bf16 MXU operands, f32 accumulation; bias-add / ReLU in f32 on the VPU.
    Padded lanes (cols 200..255) of every weight/bias are zero, so they stay
    exactly zero through all layers.
    """
    # Layer 1: cast x to bf16 in-kernel (no wrapper-side HBM pass over x).
    h = jnp.dot(x_ref[...].astype(jnp.bfloat16), w1_ref[...],
                preferred_element_type=jnp.float32)
    h_ref[...] = jnp.maximum(h + b1_ref[...], 0.0).astype(jnp.bfloat16)

    # Layers 2..3: stage bf16 activations through VMEM scratch.
    for w_ref, b_ref in ((w2_ref, b2_ref), (w3_ref, b3_ref)):
        h = jnp.dot(h_ref[...], w_ref[...], preferred_element_type=jnp.float32)
        h_ref[...] = jnp.maximum(h + b_ref[...], 0.0).astype(jnp.bfloat16)

    # Layer 4: write straight to the output block (no scratch round-trip).
    h = jnp.dot(h_ref[...], w4_ref[...], preferred_element_type=jnp.float32)
    o_ref[...] = jnp.maximum(h + b4_ref[...], 0.0)


def mnist_mlp_forward(x, weights, biases, *, max_batch_tile=MAX_BATCH_TILE,
                      trim=True):
    """x: (B, 784) f32 (or bf16).  weights: [W1 (784,256), W2..4 (256,256)]
    bf16, zero-padded past col/row 200.  biases: [(1,256)] f32, zero-padded.
    Returns (B, 200) f32, or the padded (B, 256) slab if trim=False."""
    B = x.shape[0]
    tb = _choose_batch_tile(B, max_batch_tile)
    grid = (_cdiv(B, tb),)

    def io_spec(cols):
        # Batch-tiled block, marches with the grid step (double-buffered).
        return pl.BlockSpec((tb, cols), lambda i: (i, 0))

    def resident_spec(shape):
        # Constant block index -> fetched once, VMEM-resident across steps.
        return pl.BlockSpec(shape, lambda i: (0, 0))

    in_arrays = [x]
    in_specs = [io_spec(IN_DIM)]
    for w, b in zip(weights, biases):
        in_arrays += [w, b]
        in_specs += [resident_spec(w.shape), resident_spec(b.shape)]

    out = pl.pallas_call(
        _mlp_kernel,
        out_shape=jax.ShapeDtypeStruct((B, HID_PAD), jnp.float32),
        grid=grid,
        in_specs=in_specs,
        out_specs=io_spec(HID_PAD),
        scratch_shapes=[pltpu.VMEM((tb, HID_PAD), jnp.bfloat16)],
        compiler_params=pltpu.CompilerParams(
            dimension_semantics=("parallel",)),
    )(*in_arrays)

    if trim:
        # Padded lanes are exactly zero; consumers that tolerate the 256-wide
        # slab should pass trim=False and skip this extra XLA copy.
        return out[:, :HIDDEN]
    return out


def init_params(key):
    """Kaiming-normal (relu) weights + torch-default uniform biases, padded to
    lane-aligned output widths; weights bf16, biases f32.  W1 keeps K=784."""
    logical_in = [IN_DIM] + [HIDDEN] * (N_LAYERS - 1)
    stored_in = [IN_DIM] + [HID_PAD] * (N_LAYERS - 1)
    weights, biases = [], []
    for i in range(N_LAYERS):
        key, wk, bk = jax.random.split(key, 3)
        fan_in, fan_out = logical_in[i], HIDDEN
        std = (2.0 / fan_in) ** 0.5                       # kaiming_normal_, relu
        w = std * jax.random.normal(wk, (fan_in, fan_out), dtype=jnp.float32)
        bound = 1.0 / (fan_in ** 0.5)                     # nn.Linear default bias
        b = jax.random.uniform(bk, (1, fan_out), dtype=jnp.float32,
                               minval=-bound, maxval=bound)
        # Zero-pad: padded rows/cols contribute exactly 0, so logical 200-wide
        # results are unchanged.
        w_p = jnp.zeros((stored_in[i], HID_PAD),
                        jnp.float32).at[:fan_in, :fan_out].set(w)
        b_p = jnp.zeros((1, HID_PAD), jnp.float32).at[:, :fan_out].set(b)
        weights.append(w_p.astype(jnp.bfloat16))
        biases.append(b_p)
    return weights, biases


def reference_forward(x, weights, biases):
    """Pure-JAX reference with the same bf16-operand / f32-accumulate scheme."""
    h = x.astype(jnp.bfloat16)
    hf = None
    for w, b in zip(weights, biases):
        acc = jnp.dot(h, w, preferred_element_type=jnp.float32)
        hf = jnp.maximum(acc + b, 0.0)
        h = hf.astype(jnp.bfloat16)
    return hf[:, :HIDDEN]


if __name__ == "__main__":
    key = jax.random.PRNGKey(0)
    weights, biases = init_params(key)

    # Small demo batch + a batch that exercises >=2 grid steps and a masked
    # boundary block (100 rows, tile 56 -> grid (2,)).
    for B in (8, 100):
        key, xk = jax.random.split(key)
        x = jax.random.normal(xk, (B, IN_DIM), dtype=jnp.float32)

        out = mnist_mlp_forward(x, weights, biases)
        out = jax.block_until_ready(out)

        ref = reference_forward(x, weights, biases)
        assert out.shape == (B, HIDDEN), out.shape
        assert jnp.allclose(out, ref, atol=1e-2, rtol=1e-2), \
            float(jnp.max(jnp.abs(out - ref)))

    print("KERNEL_OK")
</pallas_src>

<mosaic_0001>
module attributes {stable_mosaic.version = 11 : i64} {
  func.func @_mlp_kernel(%arg0: i32, %arg1: memref<8x784xf32, #tpu.memory_space<vmem>>, %arg2: memref<784x256xbf16, #tpu.memory_space<vmem>>, %arg3: memref<1x256xf32, #tpu.memory_space<vmem>>, %arg4: memref<256x256xbf16, #tpu.memory_space<vmem>>, %arg5: memref<1x256xf32, #tpu.memory_space<vmem>>, %arg6: memref<256x256xbf16, #tpu.memory_space<vmem>>, %arg7: memref<1x256xf32, #tpu.memory_space<vmem>>, %arg8: memref<256x256xbf16, #tpu.memory_space<vmem>>, %arg9: memref<1x256xf32, #tpu.memory_space<vmem>>, %arg10: memref<8x256xf32, #tpu.memory_space<vmem>>, %arg11: memref<8x256xbf16, #tpu.memory_space<vmem>>) attributes {dimension_semantics = [#tpu.dimension_semantics<parallel>], iteration_bounds = array<i64: 1>, scalar_prefetch = 0 : i64, scratch_operands = 1 : i64, tpu.core_type = #tpu.core_type<tc>, window_params = [{transform_indices = @transform_0, window_bounds = array<i64: 8, 784>}, {pipeline_mode = #tpu.pipeline_mode<synchronous>, transform_indices = @transform_1, window_bounds = array<i64: 784, 256>}, {pipeline_mode = #tpu.pipeline_mode<synchronous>, transform_indices = @transform_2, window_bounds = array<i64: 1, 256>}, {pipeline_mode = #tpu.pipeline_mode<synchronous>, transform_indices = @transform_3, window_bounds = array<i64: 256, 256>}, {pipeline_mode = #tpu.pipeline_mode<synchronous>, transform_indices = @transform_4, window_bounds = array<i64: 1, 256>}, {pipeline_mode = #tpu.pipeline_mode<synchronous>, transform_indices = @transform_5, window_bounds = array<i64: 256, 256>}, {pipeline_mode = #tpu.pipeline_mode<synchronous>, transform_indices = @transform_6, window_bounds = array<i64: 1, 256>}, {pipeline_mode = #tpu.pipeline_mode<synchronous>, transform_indices = @transform_7, window_bounds = array<i64: 256, 256>}, {pipeline_mode = #tpu.pipeline_mode<synchronous>, transform_indices = @transform_8, window_bounds = array<i64: 1, 256>}, {transform_indices = @transform_9, window_bounds = array<i64: 8, 256>}]} {
    %c0 = arith.constant 0 : index
    %c0_0 = arith.constant 0 : index
    %0 = vector.load %arg1[%c0, %c0_0] : memref<8x784xf32, #tpu.memory_space<vmem>>, vector<8x784xf32>
    %1 = arith.truncf %0 : vector<8x784xf32> to vector<8x784xbf16>
    %c0_1 = arith.constant 0 : index
    %c0_2 = arith.constant 0 : index
    %2 = vector.load %arg2[%c0_1, %c0_2] : memref<784x256xbf16, #tpu.memory_space<vmem>>, vector<784x256xbf16>
    %cst = arith.constant dense<0.000000e+00> : vector<8x256xf32>
    %3 = tpu.matmul %1, %2, %cst {dimension_numbers = #tpu.dot_dimension_numbers<[1], [0], [0], [1], [0, 0, 1, 1], [], []>} : vector<8x784xbf16>, vector<784x256xbf16>, vector<8x256xf32> -> vector<8x256xf32>
    %c0_3 = arith.constant 0 : index
    %c0_4 = arith.constant 0 : index
    %4 = vector.load %arg3[%c0_3, %c0_4] : memref<1x256xf32, #tpu.memory_space<vmem>>, vector<1x256xf32>
    %5 = vector.broadcast %4 : vector<1x256xf32> to vector<8x256xf32>
    %6 = arith.addf %3, %5 : vector<8x256xf32>
    %cst_5 = arith.constant 0.000000e+00 : f32
    %7 = vector.broadcast %cst_5 : f32 to vector<8x256xf32>
    %8 = arith.maximumf %6, %7 : vector<8x256xf32>
    %9 = arith.truncf %8 : vector<8x256xf32> to vector<8x256xbf16>
    %c0_6 = arith.constant 0 : index
    %c0_7 = arith.constant 0 : index
    %10 = vector.load %arg11[%c0_6, %c0_7] : memref<8x256xbf16, #tpu.memory_space<vmem>>, vector<8x256xbf16>
    tpu.vector_store %arg11[%c0_6, %c0_7], %9 {strides = array<i32>} : memref<8x256xbf16, #tpu.memory_space<vmem>>, vector<8x256xbf16>,
    %c0_8 = arith.constant 0 : index
    %c0_9 = arith.constant 0 : index
    %11 = vector.load %arg11[%c0_8, %c0_9] : memref<8x256xbf16, #tpu.memory_space<vmem>>, vector<8x256xbf16>
    %c0_10 = arith.constant 0 : index
    %c0_11 = arith.constant 0 : index
    %12 = vector.load %arg4[%c0_10, %c0_11] : memref<256x256xbf16, #tpu.memory_space<vmem>>, vector<256x256xbf16>
    %cst_12 = arith.constant dense<0.000000e+00> : vector<8x256xf32>
    %13 = tpu.matmul %11, %12, %cst_12 {dimension_numbers = #tpu.dot_dimension_numbers<[1], [0], [0], [1], [0, 0, 1, 1], [], []>} : vector<8x256xbf16>, vector<256x256xbf16>, vector<8x256xf32> -> vector<8x256xf32>
    %c0_13 = arith.constant 0 : index
    %c0_14 = arith.constant 0 : index
    %14 = vector.load %arg5[%c0_13, %c0_14] : memref<1x256xf32, #tpu.memory_space<vmem>>, vector<1x256xf32>
    %15 = vector.broadcast %14 : vector<1x256xf32> to vector<8x256xf32>
    %16 = arith.addf %13, %15 : vector<8x256xf32>
    %cst_15 = arith.constant 0.000000e+00 : f32
    %17 = vector.broadcast %cst_15 : f32 to vector<8x256xf32>
    %18 = arith.maximumf %16, %17 : vector<8x256xf32>
    %19 = arith.truncf %18 : vector<8x256xf32> to vector<8x256xbf16>
    %c0_16 = arith.constant 0 : index
    %c0_17 = arith.constant 0 : index
    %20 = vector.load %arg11[%c0_16, %c0_17] : memref<8x256xbf16, #tpu.memory_space<vmem>>, vector<8x256xbf16>
    tpu.vector_store %arg11[%c0_16, %c0_17], %19 {strides = array<i32>} : memref<8x256xbf16, #tpu.memory_space<vmem>>, vector<8x256xbf16>,
    %c0_18 = arith.constant 0 : index
    %c0_19 = arith.constant 0 : index
    %21 = vector.load %arg11[%c0_18, %c0_19] : memref<8x256xbf16, #tpu.memory_space<vmem>>, vector<8x256xbf16>
    %c0_20 = arith.constant 0 : index
    %c0_21 = arith.constant 0 : index
    %22 = vector.load %arg6[%c0_20, %c0_21] : memref<256x256xbf16, #tpu.memory_space<vmem>>, vector<256x256xbf16>
    %cst_22 = arith.constant dense<0.000000e+00> : vector<8x256xf32>
    %23 = tpu.matmul %21, %22, %cst_22 {dimension_numbers = #tpu.dot_dimension_numbers<[1], [0], [0], [1], [0, 0, 1, 1], [], []>} : vector<8x256xbf16>, vector<256x256xbf16>, vector<8x256xf32> -> vector<8x256xf32>
    %c0_23 = arith.constant 0 : index
    %c0_24 = arith.constant 0 : index
    %24 = vector.load %arg7[%c0_23, %c0_24] : memref<1x256xf32, #tpu.memory_space<vmem>>, vector<1x256xf32>
    %25 = vector.broadcast %24 : vector<1x256xf32> to vector<8x256xf32>
    %26 = arith.addf %23, %25 : vector<8x256xf32>
    %cst_25 = arith.constant 0.000000e+00 : f32
    %27 = vector.broadcast %cst_25 : f32 to vector<8x256xf32>
    %28 = arith.maximumf %26, %27 : vector<8x256xf32>
    %29 = arith.truncf %28 : vector<8x256xf32> to vector<8x256xbf16>
    %c0_26 = arith.constant 0 : index
    %c0_27 = arith.constant 0 : index
    %30 = vector.load %arg11[%c0_26, %c0_27] : memref<8x256xbf16, #tpu.memory_space<vmem>>, vector<8x256xbf16>
    tpu.vector_store %arg11[%c0_26, %c0_27], %29 {strides = array<i32>} : memref<8x256xbf16, #tpu.memory_space<vmem>>, vector<8x256xbf16>,
    %c0_28 = arith.constant 0 : index
    %c0_29 = arith.constant 0 : index
    %31 = vector.load %arg11[%c0_28, %c0_29] : memref<8x256xbf16, #tpu.memory_space<vmem>>, vector<8x256xbf16>
    %c0_30 = arith.constant 0 : index
    %c0_31 = arith.constant 0 : index
    %32 = vector.load %arg8[%c0_30, %c0_31] : memref<256x256xbf16, #tpu.memory_space<vmem>>, vector<256x256xbf16>
    %cst_32 = arith.constant dense<0.000000e+00> : vector<8x256xf32>
    %33 = tpu.matmul %31, %32, %cst_32 {dimension_numbers = #tpu.dot_dimension_numbers<[1], [0], [0], [1], [0, 0, 1, 1], [], []>} : vector<8x256xbf16>, vector<256x256xbf16>, vector<8x256xf32> -> vector<8x256xf32>
    %c0_33 = arith.constant 0 : index
    %c0_34 = arith.constant 0 : index
    %34 = vector.load %arg9[%c0_33, %c0_34] : memref<1x256xf32, #tpu.memory_space<vmem>>, vector<1x256xf32>
    %35 = vector.broadcast %34 : vector<1x256xf32> to vector<8x256xf32>
    %36 = arith.addf %33, %35 : vector<8x256xf32>
    %cst_35 = arith.constant 0.000000e+00 : f32
    %37 = vector.broadcast %cst_35 : f32 to vector<8x256xf32>
    %38 = arith.maximumf %36, %37 : vector<8x256xf32>
    %c0_36 = arith.constant 0 : index
    %c0_37 = arith.constant 0 : index
    %39 = vector.load %arg10[%c0_36, %c0_37] : memref<8x256xf32, #tpu.memory_space<vmem>>, vector<8x256xf32>
    tpu.vector_store %arg10[%c0_36, %c0_37], %38 {strides = array<i32>} : memref<8x256xf32, #tpu.memory_space<vmem>>, vector<8x256xf32>,
    return
  }
  func.func @transform_0(%arg0: i32) -> (i32, i32) {
    %c0_i32 = arith.constant 0 : i32
    %c0_i32_0 = arith.constant 0 : i32
    return %arg0, %c0_i32 : i32, i32
  }
  func.func @transform_1(%arg0: i32) -> (i32, i32) {
    %c0_i32 = arith.constant 0 : i32
    %c0_i32_0 = arith.constant 0 : i32
    %c0_i32_1 = arith.constant 0 : i32
    return %c0_i32, %c0_i32_0 : i32, i32
  }
  func.func @transform_2(%arg0: i32) -> (i32, i32) {
    %c0_i32 = arith.constant 0 : i32
    %c0_i32_0 = arith.constant 0 : i32
    %c0_i32_1 = arith.constant 0 : i32
    return %c0_i32, %c0_i32_0 : i32, i32
  }
  func.func @transform_3(%arg0: i32) -> (i32, i32) {
    %c0_i32 = arith.constant 0 : i32
    %c0_i32_0 = arith.constant 0 : i32
    %c0_i32_1 = arith.constant 0 : i32
    return %c0_i32, %c0_i32_0 : i32, i32
  }
  func.func @transform_4(%arg0: i32) -> (i32, i32) {
    %c0_i32 = arith.constant 0 : i32
    %c0_i32_0 = arith.constant 0 : i32
    %c0_i32_1 = arith.constant 0 : i32
    return %c0_i32, %c0_i32_0 : i32, i32
  }
  func.func @transform_5(%arg0: i32) -> (i32, i32) {
    %c0_i32 = arith.constant 0 : i32
    %c0_i32_0 = arith.constant 0 : i32
    %c0_i32_1 = arith.constant 0 : i32
    return %c0_i32, %c0_i32_0 : i32, i32
  }
  func.func @transform_6(%arg0: i32) -> (i32, i32) {
    %c0_i32 = arith.constant 0 : i32
    %c0_i32_0 = arith.constant 0 : i32
    %c0_i32_1 = arith.constant 0 : i32
    return %c0_i32, %c0_i32_0 : i32, i32
  }
  func.func @transform_7(%arg0: i32) -> (i32, i32) {
    %c0_i32 = arith.constant 0 : i32
    %c0_i32_0 = arith.constant 0 : i32
    %c0_i32_1 = arith.constant 0 : i32
    return %c0_i32, %c0_i32_0 : i32, i32
  }
  func.func @transform_8(%arg0: i32) -> (i32, i32) {
    %c0_i32 = arith.constant 0 : i32
    %c0_i32_0 = arith.constant 0 : i32
    %c0_i32_1 = arith.constant 0 : i32
    return %c0_i32, %c0_i32_0 : i32, i32
  }
  func.func @transform_9(%arg0: i32) -> (i32, i32) {
    %c0_i32 = arith.constant 0 : i32
    %c0_i32_0 = arith.constant 0 : i32
    return %arg0, %c0_i32 : i32, i32
  }
}

</mosaic_0001>

<bundles_post_ra>
// kernel: tpu_custom_call.1
= control target key start
LH: loop header
LB: loop body
LE: loop exit
PB: predicated region body
PF: predicated region fallthrough
CT: control target
= control target key end

     0   :  { %14 = vsyncpa [#allocation4], 0  ;;  %s2527_s0 = inlined_call_operand.hbm [shape: f32[8,784], index: 0, kind: input, shape index: {}]   ;;  %s2528_s1 = inlined_call_operand.hbm [shape: bf16[784,256], index: 1, kind: input, shape index: {}]   ;;  %s2529_s2 = inlined_call_operand.vmem [shape: f32[1,256], index: 2, kind: input, shape index: {}]   ;;  %s2530_s3 = inlined_call_operand.hbm [shape: bf16[256,256], index: 3, kind: input, shape index: {}]   ;;  %s2531_s4 = inlined_call_operand.vmem [shape: f32[1,256], index: 4, kind: input, shape index: {}]   ;;  %s2532_s5 = inlined_call_operand.hbm [shape: bf16[256,256], index: 5, kind: input, shape index: {}]   ;;  %s2533_s6 = inlined_call_operand.vmem [shape: f32[1,256], index: 6, kind: input, shape index: {}]   ;;  %s2534_s7 = inlined_call_operand.hbm [shape: bf16[256,256], index: 7, kind: input, shape index: {}]   ;;  %s2535_s8 = inlined_call_operand.vmem [shape: f32[1,256], index: 8, kind: input, shape index: {}]   ;;  %s2536_s9 = inlined_call_operand.hbm [shape: f32[8,256], index: 9, kind: output, shape index: {}]  }
   0x1   :  { %15 = vsyncpa [#allocation7], 0 }
   0x2   :  { %16 = vsyncpa [#allocation10], 0 }
   0x3   :  { %17 = vsyncpa [#allocation5], 0  ;;  %s2360_s30 = smov [#allocation6]   ;;  %s2220_s13 = scalar_lea.hbm %s2528_s1, 12544 }
   0x4   :  { %s33_s10 = sshll.u32 %s2360_s30, 4  ;;  %p2221_p0 = scmp.ne.s32.totalorder %s2528_s1, %s2220_s13  ;;  %s34_s10 = int_to_ptr.vmem [resolvable:$true] %s33_s10 }
   0x5   :  { %p2224_p1 = scmp.lt.u32.totalorder %s2220_s13, %s2528_s1 }
   0x7   :  { %p2226_p2 = pnand %p2224_p1, %p2221_p0 }
   0x9   :  { %2229 = shalt.err (!%p2226_p2)
}
   0xa   :  { %s2230_s18 = scalar_lea.vmem %s34_s10, 12544  ;;  %p2235_p4 = scmp.lt.s32.totalorder %s34_s10, %s34_s10 }
   0xb   :  { %p2231_p3 = scmp.ne.s32.totalorder %s34_s10, %s2230_s18  ;;  %p2236_p5 = scmp.lt.s32.totalorder %s2230_s18, %s2230_s18 }
   0xd   :  { %p2237_p6 = por %p2236_p5, %p2235_p4 }
   0xf   :  { %p2238_p7 = pnand %p2237_p6, %p2231_p3 }
  0x11   :  { %2241 = shalt.err (!%p2238_p7)
}
  0x12   :  { %s2361_s19 = smov 128   ;;  %s2362_s20 = smov 8  }
  0x13   :  { %39 = dma.hbm_to_vmem [thread:$0]  %s2528_s1, 12544, %s34_s10, [#allocation7], %s2361_s19, %s2361_s19, %s2362_s20  }
  0x14   :  { %s2363_s23 = smov [#allocation9]   ;;  %s2364_s25 = smov [#allocation3]  }
  0x15   :  { %s61_s24 = sshll.u32 %s2363_s23, 4  ;;  %s24_s26 = sshll.u32 %s2364_s25, 4  ;;  %s62_s24 = int_to_ptr.vmem [resolvable:$true] %s61_s24  ;;  %s25_s26 = int_to_ptr.vmem [resolvable:$true] %s24_s26 }
  0x16   :  { %s2242_s29 = scalar_lea.hbm %s2532_s5, 4096 }
  0x17   :  { %p2243_p8 = scmp.ne.s32.totalorder %s2532_s5, %s2242_s29  ;;  %p2246_p9 = scmp.lt.u32.totalorder %s2242_s29, %s2532_s5 }
  0x19   :  { %p2248_p10 = pnand %p2246_p9, %p2243_p8 }
  0x1b   :  { %2251 = shalt.err (!%p2248_p10)
}
  0x1c   :  { %s2252_s1 = scalar_lea.vmem %s62_s24, 4096  ;;  %p2257_p12 = scmp.lt.s32.totalorder %s62_s24, %s62_s24 }
  0x1d   :  { %p2253_p11 = scmp.ne.s32.totalorder %s62_s24, %s2252_s1  ;;  %p2258_p13 = scmp.lt.s32.totalorder %s2252_s1, %s2252_s1 }
  0x1f   :  { %p2259_p0 = por %p2258_p13, %p2257_p12 }
  0x21   :  { %p2260_p1 = pnand %p2259_p0, %p2253_p11 }
  0x23   :  { %2263 = shalt.err (!%p2260_p1)
}
  0x24   :  { %67 = dma.hbm_to_vmem [thread:$0]  %s2532_s5, 4096, %s62_s24, [#allocation10], %s2361_s19, %s2361_s19, %s2362_s20  }
  0x25   :  { %s2264_s17 = scalar_lea.hbm %s2527_s0, 896 }
  0x26   :  { %p2265_p2 = scmp.ne.s32.totalorder %s2527_s0, %s2264_s17  ;;  %p2268_p3 = scmp.lt.u32.totalorder %s2264_s17, %s2527_s0 }
  0x28   :  { %p2270_p4 = pnand %p2268_p3, %p2265_p2 }
  0x2a   :  { %2273 = shalt.err (!%p2270_p4)
}
  0x2b   :  { %s2274_s25 = scalar_lea.vmem %s25_s26, 896  ;;  %p2279_p6 = scmp.lt.s32.totalorder %s25_s26, %s25_s26 }
  0x2c   :  { %p2275_p5 = scmp.ne.s32.totalorder %s25_s26, %s2274_s25  ;;  %p2280_p7 = scmp.lt.s32.totalorder %s2274_s25, %s2274_s25 }
  0x2e   :  { %p2281_p8 = por %p2280_p7, %p2279_p6 }
  0x30   :  { %p2282_p9 = pnand %p2281_p8, %p2275_p5 }
  0x32   :  { %2285 = shalt.err (!%p2282_p9)
}
  0x33   :  { %27 = dma.hbm_to_vmem [thread:$0]  %s2527_s0, 896, %s25_s26, [#allocation4]  }
  0x34   :  { %s2365_s27 = smov [#allocation8]   ;;  %s2366_s29 = smov [#allocation11]  }
  0x35   :  { %s47_s28 = sshll.u32 %s2365_s27, 4  ;;  %s75_s30 = sshll.u32 %s2366_s29, 4  ;;  %s48_s28 = int_to_ptr.vmem [resolvable:$true] %s47_s28  ;;  %s76_s30 = int_to_ptr.vmem [resolvable:$true] %s75_s30 }
  0x36   :  { %s2286_s13 = scalar_lea.hbm %s2530_s3, 4096 }
  0x37   :  { %p2287_p10 = scmp.ne.s32.totalorder %s2530_s3, %s2286_s13  ;;  %p2290_p11 = scmp.lt.u32.totalorder %s2286_s13, %s2530_s3 }
  0x39   :  { %p2292_p12 = pnand %p2290_p11, %p2287_p10 }
  0x3b   :  { %2295 = shalt.err (!%p2292_p12)
}
  0x3c   :  { %s2296_s0 = scalar_lea.vmem %s48_s28, 4096  ;;  %p2301_p0 = scmp.lt.s32.totalorder %s48_s28, %s48_s28 }
  0x3d   :  { %p2297_p13 = scmp.ne.s32.totalorder %s48_s28, %s2296_s0  ;;  %p2302_p1 = scmp.lt.s32.totalorder %s2296_s0, %s2296_s0 }
  0x3f   :  { %p2303_p2 = por %p2302_p1, %p2301_p0 }
  0x41   :  { %p2304_p3 = pnand %p2303_p2, %p2297_p13 }
  0x43   :  { %2307 = shalt.err (!%p2304_p3)
}
  0x44   :  { %53 = dma.hbm_to_vmem [thread:$0]  %s2530_s3, 4096, %s48_s28, [#allocation7], %s2361_s19, %s2361_s19, %s2362_s20  }
  0x45   :  { %s2308_s21 = scalar_lea.hbm %s2534_s7, 4096 }
  0x46   :  { %p2309_p4 = scmp.ne.s32.totalorder %s2534_s7, %s2308_s21  ;;  %p2312_p5 = scmp.lt.u32.totalorder %s2308_s21, %s2534_s7 }
  0x48   :  { %p2314_p6 = pnand %p2312_p5, %p2309_p4 }
  0x4a   :  { %2317 = shalt.err (!%p2314_p6)
}
  0x4b   :  { %s2318_s24 = scalar_lea.vmem %s76_s30, 4096  ;;  %p2323_p8 = scmp.lt.s32.totalorder %s76_s30, %s76_s30 }
  0x4c   :  { %p2319_p7 = scmp.ne.s32.totalorder %s76_s30, %s2318_s24  ;;  %p2324_p9 = scmp.lt.s32.totalorder %s2318_s24, %s2318_s24 }
  0x4e   :  { %p2325_p10 = por %p2324_p9, %p2323_p8 }
  0x50   :  { %p2326_p11 = pnand %p2325_p10, %p2319_p7 }
  0x52   :  { %2329 = shalt.err (!%p2326_p11)
}
  0x53   :  { %81 = dma.hbm_to_vmem [thread:$0]  %s2534_s7, 4096, %s76_s30, [#allocation10], %s2361_s19, %s2361_s19, %s2362_s20  }
  0x54   :  { %2352 = dma.done.wait [#allocation4], 896  }
  0x55   :  { %2353 = vsyncadd [#allocation4], 4294966400 }
  0x56   :  { %2354 = dma.done.wait [#allocation7], 16640  }
  0x57   :  { %2355 = vsyncadd [#allocation7], 4294950656 }
  0x58   :  { %2356 = dma.done.wait [#allocation10], 8192  }
  0x59   :  { %2357 = vsyncadd [#allocation10], 4294959104  ;;  %v1929_v0 = vld [vmem:[#allocation6 + $0x4] ss:$8 sps:$4 sm:$0xff]   ;;  %v1931_v1 = vld [vmem:[#allocation6] ss:$8 sps:$4 sm:$0xff]  }
  0x5a   :  { %718 = vmatprep.subr.bf16.mxu0 %v1929_v0  ;;  %v1932_v2 = vld [vmem:[#allocation6 + $0x14] ss:$8 sps:$4 sm:$0xff]   ;;  %v1934_v3 = vld [vmem:[#allocation6 + $0x10] ss:$8 sps:$4 sm:$0xff]   ;;  %v1935_v4 = vld [vmem:[#allocation6 + $0x24] ss:$8 sps:$4 sm:$0xff]  }
  0x5b   :  { %719 = vmatpush1.bf16.msra.mxu0 %v1931_v1  ;;  %v1937_v5 = vld [vmem:[#allocation6 + $0x20] ss:$8 sps:$4 sm:$0xff]   ;;  %v1938_v6 = vld [vmem:[#allocation6 + $0x34] ss:$8 sps:$4 sm:$0xff]   ;;  %v1940_v7 = vld [vmem:[#allocation6 + $0x30] ss:$8 sps:$4 sm:$0xff]  }
  0x5c   :  { %720 = vmatprep.subr.bf16.mxu0 %v1932_v2  ;;  %v1941_v8 = vld [vmem:[#allocation6 + $0x44] ss:$8 sps:$4 sm:$0xff]   ;;  %v1943_v9 = vld [vmem:[#allocation6 + $0x40] ss:$8 sps:$4 sm:$0xff]   ;;  %v1944_v10 = vld [vmem:[#allocation6 + $0x54] ss:$8 sps:$4 sm:$0xff]  }
  0x5d   :  { %v1946_v11 = vld [vmem:[#allocation6 + $0x50] ss:$8 sps:$4 sm:$0xff]   ;;  %v1947_v12 = vld [vmem:[#allocation6 + $0x64] ss:$8 sps:$4 sm:$0xff]   ;;  %v1949_v15 = vld [vmem:[#allocation6 + $0x60] ss:$8 sps:$4 sm:$0xff]  }
  0x5e   :  { %v101_v13 = vld [vmem:[#allocation3 + $0x8] sm:$0xff]  ;;  %v1953_v18 = vld [vmem:[#allocation6 + $0x84] ss:$8 sps:$4 sm:$0xff]   ;;  %v1955_v19 = vld [vmem:[#allocation6 + $0x80] ss:$8 sps:$4 sm:$0xff]   ;;  %v2367_v42 = vmov 0  }
  0x5f   :  { %721 = vmatpush1.bf16.msra.mxu0 %v1934_v3  ;;  %v108_v14 = vpack.c.bf16 %v101_v13, %v101_v13  ;;  %v1950_v16 = vld [vmem:[#allocation6 + $0x74] ss:$8 sps:$4 sm:$0xff]   ;;  %v1952_v17 = vld [vmem:[#allocation6 + $0x70] ss:$8 sps:$4 sm:$0xff]   ;;  %v1959_v22 = vld [vmem:[#allocation6 + $0xa4] ss:$8 sps:$4 sm:$0xff]   ;;  %873 = vmatprep.mubr.bf16.mxu1 %v2367_v42 }
  0x60   :  { %722 = vmatprep.subr.bf16.mxu0 %v1935_v4  ;;  %v1956_v20 = vld [vmem:[#allocation6 + $0x94] ss:$8 sps:$4 sm:$0xff]   ;;  %v1958_v21 = vld [vmem:[#allocation6 + $0x90] ss:$8 sps:$4 sm:$0xff]   ;;  %v1961_v23 = vld [vmem:[#allocation6 + $0xa0] ss:$8 sps:$4 sm:$0xff]  }
  0x61   :  { %750 = vmatprep.mubr.bf16.mxu0 %v108_v14  ;;  %v1962_v24 = vld [vmem:[#allocation6 + $0xb4] ss:$8 sps:$4 sm:$0xff]   ;;  %v1964_v25 = vld [vmem:[#allocation6 + $0xb0] ss:$8 sps:$4 sm:$0xff]   ;;  %v1965_v26 = vld [vmem:[#allocation6 + $0xc4] ss:$8 sps:$4 sm:$0xff]  }
  0x62   :  { %v1967_v27 = vld [vmem:[#allocation6 + $0xc0] ss:$8 sps:$4 sm:$0xff]   ;;  %v1968_v28 = vld [vmem:[#allocation6 + $0xd4] ss:$8 sps:$4 sm:$0xff]   ;;  %v1970_v29 = vld [vmem:[#allocation6 + $0xd0] ss:$8 sps:$4 sm:$0xff]  }
  0x63   :  { %723 = vmatpush1.bf16.msra.mxu0 %v1937_v5  ;;  %v1971_v30 = vld [vmem:[#allocation6 + $0xe4] ss:$8 sps:$4 sm:$0xff]   ;;  %v1973_v31 = vld [vmem:[#allocation6 + $0xe0] ss:$8 sps:$4 sm:$0xff]   ;;  %v1974_v32 = vld [vmem:[#allocation6 + $0xf4] ss:$8 sps:$4 sm:$0xff]  }
  0x64   :  { %724 = vmatprep.subr.bf16.mxu0 %v1938_v6  ;;  %v1976_v33 = vld [vmem:[#allocation6 + $0xf0] ss:$8 sps:$4 sm:$0xff]   ;;  %v1979_v34 = vld [vmem:[#allocation6 + $0x104] ss:$8 sps:$4 sm:$0xff]   ;;  %v1977_v38 = vld [vmem:[#allocation6 + $0x100] ss:$8 sps:$4 sm:$0xff]  }
  0x65   :  { %v100_v35 = vld [vmem:[#allocation3] sm:$0xff]  ;;  %v103_v36 = vld [vmem:[#allocation3 + $0x18] sm:$0xff]  ;;  %v1982_v39 = vld [vmem:[#allocation6 + $0x114] ss:$8 sps:$4 sm:$0xff]   ;;  %vm714_vm0 = vcmask 130048  }
  0x66   :  { %v107_v37 = vpack.c.bf16 %v100_v35, %v100_v35  ;;  %v110_v40 = vpack.c.bf16 %v103_v36, %v103_v36  ;;  %v2070_v41 = vld [vmem:[#allocation6 + $0x304] ss:$8 sps:$4 sm:$0xff]   ;;  %v1980_v43 = vld [vmem:[#allocation6 + $0x110] ss:$8 sps:$4 sm:$0xff]   ;;  %v2075_v44 = vld [vmem:[#allocation6 + $0x300] ss:$8 sps:$4 sm:$0xff]  }
  0x67   :  { %725 = vmatpush1.bf16.msra.mxu0 %v1940_v7  ;;  %841 = vmatprep.subr.bf16.mxu1 %v2070_v41  ;;  %v1985_v45 = vld [vmem:[#allocation6 + $0x124] ss:$8 sps:$4 sm:$0xff]   ;;  %v106_v46 = vld [vmem:[#allocation3 + $0x30] sm:$0xff]  ;;  %v1983_v51 = vld [vmem:[#allocation6 + $0x120] ss:$8 sps:$4 sm:$0xff]  }
  0x68   :  { %726 = vmatprep.subr.bf16.mxu0 %v1941_v8  ;;  %842 = vmatpush1.bf16.msra.mxu1 %v2075_v44  ;;  %v113_v47 = vpack.c.bf16 %v106_v46, %v106_v46  ;;  %v2076_v48 = vld [vmem:[#allocation8] ss:$8 sps:$4 sm:$0xff]   ;;  %v2078_v49 = vld [vmem:[#allocation8 + $0x4] ss:$8 sps:$4 sm:$0xff]   ;;  %v2081_v50 = vld [vmem:[#allocation8 + $0x14] ss:$8 sps:$4 sm:$0xff]  }
  0x69   :  { %1105 = vmatprep.subr.bf16.mxu1 %v2078_v49  ;;  %v1988_v52 = vld [vmem:[#allocation6 + $0x134] ss:$8 sps:$4 sm:$0xff]   ;;  %v2079_v53 = vld [vmem:[#allocation8 + $0x10] ss:$8 sps:$4 sm:$0xff]   ;;  %v1986_v55 = vld [vmem:[#allocation6 + $0x130] ss:$8 sps:$4 sm:$0xff]  }
  0x6a   :  { %v2084_v54 = vld [vmem:[#allocation8 + $0x24] ss:$8 sps:$4 sm:$0xff]   ;;  %v1991_v56 = vld [vmem:[#allocation6 + $0x144] ss:$8 sps:$4 sm:$0xff]   ;;  %v2082_v57 = vld [vmem:[#allocation8 + $0x20] ss:$8 sps:$4 sm:$0xff]  }
  0x6b   :  { %727 = vmatpush1.bf16.msra.mxu0 %v1943_v9  ;;  %1793 = vmatmul.mubr.msk.bf16.vlgmr.msra.gmra.mrb[0].mxu1 %vm714_vm0, %v113_v47  ;;  %v2087_v58 = vld [vmem:[#allocation8 + $0x34] ss:$8 sps:$4 sm:$0xff]   ;;  %v1989_v59 = vld [vmem:[#allocation6 + $0x140] ss:$8 sps:$4 sm:$0xff]   ;;  %v1994_v60 = vld [vmem:[#allocation6 + $0x154] ss:$8 sps:$4 sm:$0xff]  }
  0x6c   :  { %728 = vmatprep.subr.bf16.mxu0 %v1944_v10  ;;  %1106 = vmatpush1.bf16.msra.mxu1 %v2076_v48  ;;  %v2085_v61 = vld [vmem:[#allocation8 + $0x30] ss:$8 sps:$4 sm:$0xff]   ;;  %v2090_v62 = vld [vmem:[#allocation8 + $0x44] ss:$8 sps:$4 sm:$0xff]   ;;  %v1992_v63 = vld [vmem:[#allocation6 + $0x150] ss:$8 sps:$4 sm:$0xff]  }
  0x6d   :  { %1107 = vmatprep.subr.bf16.mxu1 %v2081_v50  ;;  %v1997_v0 = vld [vmem:[#allocation6 + $0x164] ss:$8 sps:$4 sm:$0xff]   ;;  %v2088_v1 = vld [vmem:[#allocation8 + $0x40] ss:$8 sps:$4 sm:$0xff]   ;;  %v1995_v3 = vld [vmem:[#allocation6 + $0x160] ss:$8 sps:$4 sm:$0xff]  }
  0x6e   :  { %v2093_v2 = vld [vmem:[#allocation8 + $0x54] ss:$8 sps:$4 sm:$0xff]   ;;  %v2000_v4 = vld [vmem:[#allocation6 + $0x174] ss:$8 sps:$4 sm:$0xff]   ;;  %v2091_v5 = vld [vmem:[#allocation8 + $0x50] ss:$8 sps:$4 sm:$0xff]  }
  0x6f   :  { %729 = vmatpush1.bf16.msra.mxu0 %v1946_v11  ;;  %v2096_v6 = vld [vmem:[#allocation8 + $0x64] ss:$8 sps:$4 sm:$0xff]   ;;  %v1998_v7 = vld [vmem:[#allocation6 + $0x170] ss:$8 sps:$4 sm:$0xff]   ;;  %v2003_v8 = vld [vmem:[#allocation6 + $0x184] ss:$8 sps:$4 sm:$0xff]  }
  0x70   :  { %730 = vmatprep.subr.bf16.mxu0 %v1947_v12  ;;  %1108 = vmatpush1.bf16.msra.mxu1 %v2079_v53  ;;  %v2094_v9 = vld [vmem:[#allocation8 + $0x60] ss:$8 sps:$4 sm:$0xff]   ;;  %v2099_v10 = vld [vmem:[#allocation8 + $0x74] ss:$8 sps:$4 sm:$0xff]   ;;  %v2001_v11 = vld [vmem:[#allocation6 + $0x180] ss:$8 sps:$4 sm:$0xff]  }
  0x71   :  { %1109 = vmatprep.subr.bf16.mxu1 %v2084_v54  ;;  %v2006_v12 = vld [vmem:[#allocation6 + $0x194] ss:$8 sps:$4 sm:$0xff]   ;;  %v2097_v13 = vld [vmem:[#allocation8 + $0x70] ss:$8 sps:$4 sm:$0xff]   ;;  %v2022_v36 = vld [vmem:[#allocation6 + $0x1f0] ss:$8 sps:$4 sm:$0xff]  }
  0x72   :  { %v2102_v14 = vld [vmem:[#allocation8 + $0x84] ss:$8 sps:$4 sm:$0xff]   ;;  %v2025_v41 = vld [vmem:[#allocation6 + $0x200] ss:$8 sps:$4 sm:$0xff]   ;;  %v2028_v44 = vld [vmem:[#allocation6 + $0x210] ss:$8 sps:$4 sm:$0xff]  }
  0x73   :  { %731 = vmatpush1.bf16.msra.mxu0 %v1949_v15  ;;  %v2004_v15 = vld [vmem:[#allocation6 + $0x190] ss:$8 sps:$4 sm:$0xff]   ;;  %v2024_v35 = vld [vmem:[#allocation6 + $0x1f4] ss:$8 sps:$4 sm:$0xff]   ;;  %v2031_v46 = vld [vmem:[#allocation6 + $0x220] ss:$8 sps:$4 sm:$0xff]  }
  0x74   :  { %732 = vmatprep.subr.bf16.mxu0 %v1950_v16  ;;  %1110 = vmatpush1.bf16.msra.mxu1 %v2082_v57  ;;  %v2009_v16 = vld [vmem:[#allocation6 + $0x1a4] ss:$8 sps:$4 sm:$0xff]   ;;  %v2036_v47 = vld [vmem:[#allocation6 + $0x234] ss:$8 sps:$4 sm:$0xff]   ;;  %v2034_v48 = vld [vmem:[#allocation6 + $0x230] ss:$8 sps:$4 sm:$0xff]  }
  0x75   :  { %1111 = vmatprep.subr.bf16.mxu1 %v2087_v58  ;;  %v2039_v49 = vld [vmem:[#allocation6 + $0x244] ss:$8 sps:$4 sm:$0xff]   ;;  %v2037_v50 = vld [vmem:[#allocation6 + $0x240] ss:$8 sps:$4 sm:$0xff]   ;;  %v2046_v58 = vld [vmem:[#allocation6 + $0x270] ss:$8 sps:$4 sm:$0xff]  }
  0x76   :  { %v2045_v53 = vld [vmem:[#allocation6 + $0x264] ss:$8 sps:$4 sm:$0xff]   ;;  %v2043_v54 = vld [vmem:[#allocation6 + $0x260] ss:$8 sps:$4 sm:$0xff]  }
  0x77   :  { %733 = vmatpush1.bf16.msra.mxu0 %v1952_v17  ;;  %v2100_v17 = vld [vmem:[#allocation8 + $0x80] ss:$8 sps:$4 sm:$0xff]   ;;  %v2117_v57 = vld [vmem:[#allocation8 + $0xd4] ss:$8 sps:$4 sm:$0xff]  }
  0x78   :  { %734 = vmatprep.subr.bf16.mxu0 %v1953_v18  ;;  %1112 = vmatpush1.bf16.msra.mxu1 %v2085_v61  ;;  %v2105_v18 = vld [vmem:[#allocation8 + $0x94] ss:$8 sps:$4 sm:$0xff]   ;;  %v2054_v61 = vld [vmem:[#allocation6 + $0x294] ss:$8 sps:$4 sm:$0xff]  }
  0x79   :  { %1113 = vmatprep.subr.bf16.mxu1 %v2090_v62  ;;  %v2052_v62 = vld [vmem:[#allocation6 + $0x290] ss:$8 sps:$4 sm:$0xff]  }
  0x7b   :  { %735 = vmatpush1.bf16.msra.mxu0 %v1955_v19  ;;  %v2007_v19 = vld [vmem:[#allocation6 + $0x1a0] ss:$8 sps:$4 sm:$0xff]  }
  0x7c   :  { %736 = vmatprep.subr.bf16.mxu0 %v1956_v20  ;;  %1114 = vmatpush1.bf16.msra.mxu1 %v2088_v1  ;;  %v2012_v20 = vld [vmem:[#allocation6 + $0x1b4] ss:$8 sps:$4 sm:$0xff]  }
  0x7d   :  { %1115 = vmatprep.subr.bf16.mxu1 %v2093_v2  ;;  %v2060_v1 = vld [vmem:[#allocation6 + $0x2b4] ss:$8 sps:$4 sm:$0xff]   ;;  %v2058_v2 = vld [vmem:[#allocation6 + $0x2b0] ss:$8 sps:$4 sm:$0xff]  }
  0x7f   :  { %737 = vmatpush1.bf16.msra.mxu0 %v1958_v21  ;;  %v2103_v21 = vld [vmem:[#allocation8 + $0x90] ss:$8 sps:$4 sm:$0xff]  }
  0x80   :  { %738 = vmatprep.subr.bf16.mxu0 %v1959_v22  ;;  %1116 = vmatpush1.bf16.msra.mxu1 %v2091_v5  ;;  %v2108_v22 = vld [vmem:[#allocation8 + $0xa4] ss:$8 sps:$4 sm:$0xff]  }
  0x81   :  { %1117 = vmatprep.subr.bf16.mxu1 %v2096_v6  ;;  %v2066_v5 = vld [vmem:[#allocation6 + $0x2d4] ss:$8 sps:$4 sm:$0xff]   ;;  %v2064_v6 = vld [vmem:[#allocation6 + $0x2d0] ss:$8 sps:$4 sm:$0xff]  }
  0x83   :  { %739 = vmatpush1.bf16.msra.mxu0 %v1961_v23  ;;  %v2010_v23 = vld [vmem:[#allocation6 + $0x1b0] ss:$8 sps:$4 sm:$0xff]  }
  0x84   :  { %740 = vmatprep.subr.bf16.mxu0 %v1962_v24  ;;  %1118 = vmatpush1.bf16.msra.mxu1 %v2094_v9  ;;  %v2015_v24 = vld [vmem:[#allocation6 + $0x1c4] ss:$8 sps:$4 sm:$0xff]   ;;  %v2074_v9 = vld [vmem:[#allocation6 + $0x2f4] ss:$8 sps:$4 sm:$0xff]  }
  0x85   :  { %1119 = vmatprep.subr.bf16.mxu1 %v2099_v10  ;;  %v2072_v10 = vld [vmem:[#allocation6 + $0x2f0] ss:$8 sps:$4 sm:$0xff]  }
  0x87   :  { %741 = vmatpush1.bf16.msra.mxu0 %v1964_v25  ;;  %v2106_v25 = vld [vmem:[#allocation8 + $0xa0] ss:$8 sps:$4 sm:$0xff]  }
  0x88   :  { %742 = vmatprep.subr.bf16.mxu0 %v1965_v26  ;;  %1120 = vmatpush1.bf16.msra.mxu1 %v2097_v13  ;;  %v2111_v26 = vld [vmem:[#allocation8 + $0xb4] ss:$8 sps:$4 sm:$0xff]   ;;  %v2120_v13 = vld [vmem:[#allocation8 + $0xe4] ss:$8 sps:$4 sm:$0xff]  }
  0x89   :  { %1121 = vmatprep.subr.bf16.mxu1 %v2102_v14  ;;  %v2118_v14 = vld [vmem:[#allocation8 + $0xe0] ss:$8 sps:$4 sm:$0xff]  }
  0x8b   :  { %743 = vmatpush1.bf16.msra.mxu0 %v1967_v27  ;;  %v2013_v27 = vld [vmem:[#allocation6 + $0x1c0] ss:$8 sps:$4 sm:$0xff]  }
  0x8c   :  { %744 = vmatprep.subr.bf16.mxu0 %v1968_v28  ;;  %1122 = vmatpush1.bf16.msra.mxu1 %v2100_v17  ;;  %v2018_v28 = vld [vmem:[#allocation6 + $0x1d4] ss:$8 sps:$4 sm:$0xff]  }
  0x8d   :  { %1123 = vmatprep.subr.bf16.mxu1 %v2105_v18  ;;  %v2121_v18 = vld [vmem:[#allocation8 + $0xf0] ss:$8 sps:$4 sm:$0xff]  }
  0x8f   :  { %745 = vmatpush1.bf16.msra.mxu0 %v1970_v29  ;;  %v2109_v29 = vld [vmem:[#allocation8 + $0xb0] ss:$8 sps:$4 sm:$0xff]  }
  0x90   :  { %746 = vmatprep.subr.bf16.mxu0 %v1971_v30  ;;  %1124 = vmatpush1.bf16.msra.mxu1 %v2103_v21  ;;  %v2114_v30 = vld [vmem:[#allocation8 + $0xc4] ss:$8 sps:$4 sm:$0xff]  }
  0x91   :  { %1125 = vmatprep.subr.bf16.mxu1 %v2108_v22  ;;  %v2126_v21 = vld [vmem:[#allocation9 + $0x4] ss:$8 sps:$4 sm:$0xff]   ;;  %v214_v22 = vlaneseq }
  0x93   :  { %747 = vmatpush1.bf16.msra.mxu0 %v1973_v31  ;;  %v2016_v31 = vld [vmem:[#allocation6 + $0x1d0] ss:$8 sps:$4 sm:$0xff]  }
  0x94   :  { %748 = vmatprep.subr.bf16.mxu0 %v1974_v32  ;;  %1126 = vmatpush1.bf16.msra.mxu1 %v2106_v25  ;;  %v2021_v32 = vld [vmem:[#allocation6 + $0x1e4] ss:$8 sps:$4 sm:$0xff]   ;;  %v212_v25 = vld [vmem:[%s2529_s2] sm:$0x3] }
  0x95   :  { %1127 = vmatprep.subr.bf16.mxu1 %v2111_v26 }
  0x97   :  { %749 = vmatpush1.bf16.msra.mxu0 %v1976_v33  ;;  %v2112_v33 = vld [vmem:[#allocation8 + $0xc0] ss:$8 sps:$4 sm:$0xff]  }
  0x98   :  { %759 = vmatprep.subr.bf16.mxu0 %v1979_v34  ;;  %1128 = vmatpush1.bf16.msra.mxu1 %v2109_v29  ;;  %v2019_v34 = vld [vmem:[#allocation6 + $0x1e0] ss:$8 sps:$4 sm:$0xff]  }
  0x99   :  { %1129 = vmatprep.subr.bf16.mxu1 %v2114_v30 }
  0x9a   :  { %751 = vmatmul.mubr.bf16.vlgmr.msra.gmra.mrb[0].mxu0 %v107_v37  ;;  %v102_v37 = vld [vmem:[#allocation3 + $0x10] sm:$0xff] }
  0x9b   :  { %760 = vmatpush1.bf16.msra.mxu0 %v1977_v38  ;;  %791 = vmatprep.mubr.bf16.mxu0 %v110_v40  ;;  %v2027_v38 = vld [vmem:[#allocation6 + $0x204] ss:$8 sps:$4 sm:$0xff]   ;;  %v109_v40 = vpack.c.bf16 %v102_v37, %v102_v37 }
  0x9c   :  { %761 = vmatprep.subr.bf16.mxu0 %v1982_v39  ;;  %1130 = vmatpush1.bf16.msra.mxu1 %v2112_v33  ;;  %v105_v39 = vld [vmem:[#allocation3 + $0x28] sm:$0xff] }
  0x9d   :  { %v112_v42 = vpack.c.bf16 %v105_v39, %v105_v39  ;;  %1131 = vmatprep.subr.bf16.mxu1 %v2117_v57  ;;  %v2148_v57 = vld [vmem:[#allocation9 + $0x80] ss:$8 sps:$4 sm:$0xff]  }
  0x9f   :  { %762 = vmatpush1.bf16.msra.mxu0 %v1980_v43  ;;  %v2030_v43 = vld [vmem:[#allocation6 + $0x214] ss:$8 sps:$4 sm:$0xff]  }
  0xa0   :  { %763 = vmatprep.subr.bf16.mxu0 %v1985_v45  ;;  %v2033_v45 = vld [vmem:[#allocation6 + $0x224] ss:$8 sps:$4 sm:$0xff]  }
  0xa3   :  { %764 = vmatpush1.bf16.msra.mxu0 %v1983_v51  ;;  %v2042_v51 = vld [vmem:[#allocation6 + $0x254] ss:$8 sps:$4 sm:$0xff]  }
  0xa4   :  { %765 = vmatprep.subr.bf16.mxu0 %v1988_v52  ;;  %v2040_v52 = vld [vmem:[#allocation6 + $0x250] ss:$8 sps:$4 sm:$0xff]  }
  0xa7   :  { %766 = vmatpush1.bf16.msra.mxu0 %v1986_v55  ;;  %v2048_v55 = vld [vmem:[#allocation6 + $0x274] ss:$8 sps:$4 sm:$0xff]  }
  0xa8   :  { %767 = vmatprep.subr.bf16.mxu0 %v1991_v56  ;;  %v2115_v56 = vld [vmem:[#allocation8 + $0xd0] ss:$8 sps:$4 sm:$0xff]  }
  0xa9   :  { %1132 = vmatpush1.bf16.msra.mxu1 %v2115_v56  ;;  %v2150_v56 = vld [vmem:[#allocation9 + $0x84] ss:$8 sps:$4 sm:$0xff]  }
  0xaa   :  { %1133 = vmatprep.subr.bf16.mxu1 %v2120_v13 }
  0xab   :  { %768 = vmatpush1.bf16.msra.mxu0 %v1989_v59  ;;  %v2051_v59 = vld [vmem:[#allocation6 + $0x284] ss:$8 sps:$4 sm:$0xff]  }
  0xac   :  { %769 = vmatprep.subr.bf16.mxu0 %v1994_v60  ;;  %v2049_v60 = vld [vmem:[#allocation6 + $0x280] ss:$8 sps:$4 sm:$0xff]  }
  0xad   :  { %1134 = vmatpush1.bf16.msra.mxu1 %v2118_v14 }
  0xaf   :  { %770 = vmatpush1.bf16.msra.mxu0 %v1992_v63  ;;  %v2057_v63 = vld [vmem:[#allocation6 + $0x2a4] ss:$8 sps:$4 sm:$0xff]  }
  0xb0   :  { %771 = vmatprep.subr.bf16.mxu0 %v1997_v0  ;;  %v2055_v0 = vld [vmem:[#allocation6 + $0x2a0] ss:$8 sps:$4 sm:$0xff]  }
  0xb3   :  { %772 = vmatpush1.bf16.msra.mxu0 %v1995_v3  ;;  %v2063_v3 = vld [vmem:[#allocation6 + $0x2c4] ss:$8 sps:$4 sm:$0xff]  }
  0xb4   :  { %773 = vmatprep.subr.bf16.mxu0 %v2000_v4  ;;  %v2061_v4 = vld [vmem:[#allocation6 + $0x2c0] ss:$8 sps:$4 sm:$0xff]  }
  0xb7   :  { %774 = vmatpush1.bf16.msra.mxu0 %v1998_v7  ;;  %v2069_v7 = vld [vmem:[#allocation6 + $0x2e4] ss:$8 sps:$4 sm:$0xff]  }
  0xb8   :  { %775 = vmatprep.subr.bf16.mxu0 %v2003_v8  ;;  %v2067_v8 = vld [vmem:[#allocation6 + $0x2e0] ss:$8 sps:$4 sm:$0xff]  }
  0xbb   :  { %776 = vmatpush1.bf16.msra.mxu0 %v2001_v11  ;;  %v104_v11 = vld [vmem:[#allocation3 + $0x20] sm:$0xff] }
  0xbc   :  { %777 = vmatprep.subr.bf16.mxu0 %v2006_v12  ;;  %v111_v12 = vpack.c.bf16 %v104_v11, %v104_v11 }
  0xbf   :  { %778 = vmatpush1.bf16.msra.mxu0 %v2004_v15 }
  0xc0   :  { %779 = vmatprep.subr.bf16.mxu0 %v2009_v16  ;;  %v2123_v16 = vld [vmem:[#allocation8 + $0xf4] ss:$8 sps:$4 sm:$0xff]  }
  0xc1   :  { %1135 = vmatprep.subr.bf16.mxu1 %v2123_v16 }
  0xc2   :  { %1136 = vmatpush1.bf16.msra.mxu1 %v2121_v18 }
  0xc3   :  { %780 = vmatpush1.bf16.msra.mxu0 %v2007_v19  ;;  %1369 = vmatprep.subr.bf16.mxu1 %v2126_v21  ;;  %v2172_v21 = vld [vmem:[#allocation11] ss:$8 sps:$4 sm:$0xff]  }
  0xc4   :  { %781 = vmatprep.subr.bf16.mxu0 %v2012_v20 }
  0xc7   :  { %782 = vmatpush1.bf16.msra.mxu0 %v2010_v23  ;;  %v215_v23 = vshrl.u32 %v214_v22, 7 }
  0xc8   :  { %783 = vmatprep.subr.bf16.mxu0 %v2015_v24 }
  0xc9   :  { %v2491_v24 = vsub.s32 0, %v215_v23  ;;  %v2496_v26 = vsub.s32 1, %v215_v23  ;;  %v2177_v23 = vld [vmem:[#allocation11 + $0x14] ss:$8 sps:$4 sm:$0xff]  }
  0xcb   :  { %784 = vmatpush1.bf16.msra.mxu0 %v2013_v27  ;;  %v217_v27 = vrot.slane %v212_v25, %v2491_v24 }
  0xcc   :  { %785 = vmatprep.subr.bf16.mxu0 %v2018_v28  ;;  %v221_v28 = vrot.slane %v212_v25, %v2496_v26  ;;  %v2175_v25 = vld [vmem:[#allocation11 + $0x10] ss:$8 sps:$4 sm:$0xff]  }
  0xcf   :  { %786 = vmatpush1.bf16.msra.mxu0 %v2016_v31 }
  0xd0   :  { %787 = vmatprep.subr.bf16.mxu0 %v2021_v32 }
  0xd3   :  { %788 = vmatpush1.bf16.msra.mxu0 %v2019_v34 }
  0xd4   :  { %789 = vmatprep.subr.bf16.mxu0 %v2024_v35 }
  0xd7   :  { %790 = vmatpush1.bf16.msra.mxu0 %v2022_v36 }
  0xd8   :  { %800 = vmatprep.subr.bf16.mxu0 %v2027_v38 }
  0xda   :  { %792 = vmatmul.mubr.bf16.vlgmr.msra.gmra.mrb[0].mxu0 %v109_v40  ;;  %v2124_v40 = vld [vmem:[#allocation9] ss:$8 sps:$4 sm:$0xff]  }
  0xdb   :  { %801 = vmatpush1.bf16.msra.mxu0 %v2025_v41  ;;  %832 = vmatprep.mubr.bf16.mxu0 %v112_v42  ;;  %v2129_v42 = vld [vmem:[#allocation9 + $0x14] ss:$8 sps:$4 sm:$0xff]  }
  0xdc   :  { %802 = vmatprep.subr.bf16.mxu0 %v2030_v43  ;;  %v2127_v43 = vld [vmem:[#allocation9 + $0x10] ss:$8 sps:$4 sm:$0xff]  }
  0xdf   :  { %803 = vmatpush1.bf16.msra.mxu0 %v2028_v44  ;;  %v2132_v44 = vld [vmem:[#allocation9 + $0x24] ss:$8 sps:$4 sm:$0xff]  }
  0xe0   :  { %804 = vmatprep.subr.bf16.mxu0 %v2033_v45  ;;  %v2130_v45 = vld [vmem:[#allocation9 + $0x20] ss:$8 sps:$4 sm:$0xff]  }
  0xe3   :  { %805 = vmatpush1.bf16.msra.mxu0 %v2031_v46  ;;  %v2135_v46 = vld [vmem:[#allocation9 + $0x34] ss:$8 sps:$4 sm:$0xff]  }
  0xe4   :  { %806 = vmatprep.subr.bf16.mxu0 %v2036_v47  ;;  %v2133_v47 = vld [vmem:[#allocation9 + $0x30] ss:$8 sps:$4 sm:$0xff]  }
  0xe7   :  { %807 = vmatpush1.bf16.msra.mxu0 %v2034_v48  ;;  %v2138_v48 = vld [vmem:[#allocation9 + $0x44] ss:$8 sps:$4 sm:$0xff]  }
  0xe8   :  { %808 = vmatprep.subr.bf16.mxu0 %v2039_v49  ;;  %v2136_v49 = vld [vmem:[#allocation9 + $0x40] ss:$8 sps:$4 sm:$0xff]  }
  0xeb   :  { %809 = vmatpush1.bf16.msra.mxu0 %v2037_v50  ;;  %v2141_v50 = vld [vmem:[#allocation9 + $0x54] ss:$8 sps:$4 sm:$0xff]  }
  0xec   :  { %810 = vmatprep.subr.bf16.mxu0 %v2042_v51  ;;  %v2139_v51 = vld [vmem:[#allocation9 + $0x50] ss:$8 sps:$4 sm:$0xff]  }
  0xef   :  { %811 = vmatpush1.bf16.msra.mxu0 %v2040_v52  ;;  %v2144_v52 = vld [vmem:[#allocation9 + $0x64] ss:$8 sps:$4 sm:$0xff]  }
  0xf0   :  { %812 = vmatprep.subr.bf16.mxu0 %v2045_v53  ;;  %v2142_v53 = vld [vmem:[#allocation9 + $0x60] ss:$8 sps:$4 sm:$0xff]  }
  0xf3   :  { %813 = vmatpush1.bf16.msra.mxu0 %v2043_v54  ;;  %v2147_v54 = vld [vmem:[#allocation9 + $0x74] ss:$8 sps:$4 sm:$0xff]  }
  0xf4   :  { %814 = vmatprep.subr.bf16.mxu0 %v2048_v55  ;;  %v2145_v55 = vld [vmem:[#allocation9 + $0x70] ss:$8 sps:$4 sm:$0xff]  }
  0xf7   :  { %815 = vmatpush1.bf16.msra.mxu0 %v2046_v58  ;;  %v2153_v58 = vld [vmem:[#allocation9 + $0x94] ss:$8 sps:$4 sm:$0xff]  }
  0xf8   :  { %816 = vmatprep.subr.bf16.mxu0 %v2051_v59  ;;  %v2151_v59 = vld [vmem:[#allocation9 + $0x90] ss:$8 sps:$4 sm:$0xff]  }
  0xfb   :  { %817 = vmatpush1.bf16.msra.mxu0 %v2049_v60  ;;  %v2156_v60 = vld [vmem:[#allocation9 + $0xa4] ss:$8 sps:$4 sm:$0xff]  }
  0xfc   :  { %818 = vmatprep.subr.bf16.mxu0 %v2054_v61  ;;  %v2154_v61 = vld [vmem:[#allocation9 + $0xa0] ss:$8 sps:$4 sm:$0xff]  }
  0xff   :  { %819 = vmatpush1.bf16.msra.mxu0 %v2052_v62  ;;  %v2159_v62 = vld [vmem:[#allocation9 + $0xb4] ss:$8 sps:$4 sm:$0xff]  }
 0x100   :  { %820 = vmatprep.subr.bf16.mxu0 %v2057_v63  ;;  %v2157_v63 = vld [vmem:[#allocation9 + $0xb0] ss:$8 sps:$4 sm:$0xff]  }
 0x103   :  { %821 = vmatpush1.bf16.msra.mxu0 %v2055_v0  ;;  %v2162_v0 = vld [vmem:[#allocation9 + $0xc4] ss:$8 sps:$4 sm:$0xff]  }
 0x104   :  { %822 = vmatprep.subr.bf16.mxu0 %v2060_v1  ;;  %v2160_v1 = vld [vmem:[#allocation9 + $0xc0] ss:$8 sps:$4 sm:$0xff]  }
 0x107   :  { %823 = vmatpush1.bf16.msra.mxu0 %v2058_v2  ;;  %v2165_v2 = vld [vmem:[#allocation9 + $0xd4] ss:$8 sps:$4 sm:$0xff]  }
 0x108   :  { %824 = vmatprep.subr.bf16.mxu0 %v2063_v3  ;;  %v2163_v3 = vld [vmem:[#allocation9 + $0xd0] ss:$8 sps:$4 sm:$0xff]  }
 0x10b   :  { %825 = vmatpush1.bf16.msra.mxu0 %v2061_v4  ;;  %v2168_v4 = vld [vmem:[#allocation9 + $0xe4] ss:$8 sps:$4 sm:$0xff]  }
 0x10c   :  { %826 = vmatprep.subr.bf16.mxu0 %v2066_v5  ;;  %v2166_v5 = vld [vmem:[#allocation9 + $0xe0] ss:$8 sps:$4 sm:$0xff]  }
 0x10f   :  { %827 = vmatpush1.bf16.msra.mxu0 %v2064_v6  ;;  %v2171_v6 = vld [vmem:[#allocation9 + $0xf4] ss:$8 sps:$4 sm:$0xff]  }
 0x110   :  { %828 = vmatprep.subr.bf16.mxu0 %v2069_v7  ;;  %v2169_v7 = vld [vmem:[#allocation9 + $0xf0] ss:$8 sps:$4 sm:$0xff]  }
 0x113   :  { %829 = vmatpush1.bf16.msra.mxu0 %v2067_v8  ;;  %v2174_v8 = vld [vmem:[#allocation11 + $0x4] ss:$8 sps:$4 sm:$0xff]  }
 0x114   :  { %830 = vmatprep.subr.bf16.mxu0 %v2074_v9  ;;  %v926_v9 = vld [vmem:[%s2531_s4] sm:$0x3] }
 0x115   :  { %v935_v11 = vrot.slane %v926_v9, %v2496_v26 }
 0x117   :  { %831 = vmatpush1.bf16.msra.mxu0 %v2072_v10  ;;  %v931_v10 = vrot.slane %v926_v9, %v2491_v24 }
 0x11a   :  { %833 = vmatmul.mubr.bf16.vlgmr.msra.gmra.mrb[0].mxu0 %v111_v12 }
 0x13e   :  { %v875_v15 = vpop.f32.mrb[0].mxu1 }
 0x13f   :  { %v877_v17 = vpop.f32.mrb[1].mxu1 }
 0x140   :  { %v879_v19 = vpop.f32.mrb[2].mxu1 }
 0x141   :  { %v880_v20 = vpop.f32.mrb[3].mxu1 }
 0x1ed   :  { %v834_v29 = vpop.f32.mrb[0].mxu0 }
 0x1ee   :  { %v1908_v30 = vadd.f32 %v834_v29, %v217_v27  ;;  %v836_v31 = vpop.f32.mrb[1].mxu0  ;;  %v2180_v27 = vld [vmem:[#allocation11 + $0x24] ss:$8 sps:$4 sm:$0xff]   ;;  %v2183_v29 = vld [vmem:[#allocation11 + $0x34] ss:$8 sps:$4 sm:$0xff]  }
 0x1ef   :  { %v1910_v32 = vadd.f32 %v836_v31, %v221_v28  ;;  %v838_v33 = vpop.f32.mrb[2].mxu0  ;;  %v2178_v28 = vld [vmem:[#allocation11 + $0x20] ss:$8 sps:$4 sm:$0xff]   ;;  %v2186_v31 = vld [vmem:[#allocation11 + $0x44] ss:$8 sps:$4 sm:$0xff]  }
 0x1f0   :  { %v1909_v34 = vadd.f32 %v1908_v30, %v875_v15  ;;  %v839_v35 = vpop.f32.mrb[3].mxu0  ;;  %v2181_v30 = vld [vmem:[#allocation11 + $0x30] ss:$8 sps:$4 sm:$0xff]   ;;  %v2189_v33 = vld [vmem:[#allocation11 + $0x54] ss:$8 sps:$4 sm:$0xff]  }
 0x1f1   :  { %v1911_v36 = vadd.f32 %v1910_v32, %v877_v17  ;;  %v2184_v32 = vld [vmem:[#allocation11 + $0x40] ss:$8 sps:$4 sm:$0xff]   ;;  %v2192_v35 = vld [vmem:[#allocation11 + $0x64] ss:$8 sps:$4 sm:$0xff]  }
 0x1f2   :  { %v882_v37 = vmax.f32 %v1909_v34, 0.0  ;;  %v2187_v34 = vld [vmem:[#allocation11 + $0x50] ss:$8 sps:$4 sm:$0xff]  }
 0x1f3   :  { %v883_v38 = vmax.f32 %v1911_v36, 0.0  ;;  %v2190_v36 = vld [vmem:[#allocation11 + $0x60] ss:$8 sps:$4 sm:$0xff]  }
 0x1f4   :  { %v1902_v41 = vpack.c.bf16 %v882_v37, %v882_v37  ;;  %v2195_v37 = vld [vmem:[#allocation11 + $0x74] ss:$8 sps:$4 sm:$0xff]  }
 0x1f5   :  { %v1903_v39 = vpack.c.bf16 %v883_v38, %v883_v38  ;;  %v2193_v38 = vld [vmem:[#allocation11 + $0x70] ss:$8 sps:$4 sm:$0xff]  }
 0x1f7   :  { %1137 = vmatprep.mubr.bf16.mxu1 %v1903_v39  ;;  %v2198_v39 = vld [vmem:[#allocation11 + $0x84] ss:$8 sps:$4 sm:$0xff]  }
 0x1f8   :  { %1138 = vmatmul.mubr.bf16.vlgmr.msra.gmra.mrb[4].mxu1 %v1902_v41  ;;  %v2201_v41 = vld [vmem:[#allocation11 + $0x94] ss:$8 sps:$4 sm:$0xff]  }
 0x1f9   :  { %1370 = vmatpush1.bf16.msra.mxu1 %v2124_v40  ;;  %v2196_v40 = vld [vmem:[#allocation11 + $0x80] ss:$8 sps:$4 sm:$0xff]  }
 0x1fa   :  { %1371 = vmatprep.subr.bf16.mxu1 %v2129_v42  ;;  %v2199_v42 = vld [vmem:[#allocation11 + $0x90] ss:$8 sps:$4 sm:$0xff]  }
 0x1fd   :  { %1372 = vmatpush1.bf16.msra.mxu1 %v2127_v43  ;;  %v2204_v43 = vld [vmem:[#allocation11 + $0xa4] ss:$8 sps:$4 sm:$0xff]  }
 0x1fe   :  { %1373 = vmatprep.subr.bf16.mxu1 %v2132_v44  ;;  %v2202_v44 = vld [vmem:[#allocation11 + $0xa0] ss:$8 sps:$4 sm:$0xff]  }
 0x201   :  { %1374 = vmatpush1.bf16.msra.mxu1 %v2130_v45  ;;  %v2207_v45 = vld [vmem:[#allocation11 + $0xb4] ss:$8 sps:$4 sm:$0xff]  }
 0x202   :  { %1375 = vmatprep.subr.bf16.mxu1 %v2135_v46  ;;  %v2205_v46 = vld [vmem:[#allocation11 + $0xb0] ss:$8 sps:$4 sm:$0xff]  }
 0x205   :  { %1376 = vmatpush1.bf16.msra.mxu1 %v2133_v47  ;;  %v2210_v47 = vld [vmem:[#allocation11 + $0xc4] ss:$8 sps:$4 sm:$0xff]  }
 0x206   :  { %1377 = vmatprep.subr.bf16.mxu1 %v2138_v48  ;;  %v2208_v48 = vld [vmem:[#allocation11 + $0xc0] ss:$8 sps:$4 sm:$0xff]  }
 0x209   :  { %1378 = vmatpush1.bf16.msra.mxu1 %v2136_v49  ;;  %v2213_v49 = vld [vmem:[#allocation11 + $0xd4] ss:$8 sps:$4 sm:$0xff]  }
 0x20a   :  { %1379 = vmatprep.subr.bf16.mxu1 %v2141_v50  ;;  %v2211_v50 = vld [vmem:[#allocation11 + $0xd0] ss:$8 sps:$4 sm:$0xff]  }
 0x20d   :  { %1380 = vmatpush1.bf16.msra.mxu1 %v2139_v51  ;;  %v2216_v51 = vld [vmem:[#allocation11 + $0xe4] ss:$8 sps:$4 sm:$0xff]  }
 0x20e   :  { %1381 = vmatprep.subr.bf16.mxu1 %v2144_v52  ;;  %v2214_v52 = vld [vmem:[#allocation11 + $0xe0] ss:$8 sps:$4 sm:$0xff]  }
 0x211   :  { %1382 = vmatpush1.bf16.msra.mxu1 %v2142_v53  ;;  %v2219_v53 = vld [vmem:[#allocation11 + $0xf4] ss:$8 sps:$4 sm:$0xff]  }
 0x212   :  { %1383 = vmatprep.subr.bf16.mxu1 %v2147_v54  ;;  %v2217_v54 = vld [vmem:[#allocation11 + $0xf0] ss:$8 sps:$4 sm:$0xff]  }
 0x215   :  { %1384 = vmatpush1.bf16.msra.mxu1 %v2145_v55  ;;  %v1190_v55 = vld [vmem:[%s2533_s6] sm:$0x3]  ;;  %s2368_s6 = smov [#allocation12]  }
 0x216   :  { %1385 = vmatprep.subr.bf16.mxu1 %v2150_v56  ;;  %v1195_v56 = vrot.slane %v1190_v55, %v2491_v24  ;;  %s1684_s11 = sshll.u32 %s2368_s6, 4  ;;  %s1685_s11 = int_to_ptr.vmem [resolvable:$true] %s1684_s11 }
 0x217   :  { %s2330_s12 = scalar_lea.vmem %s1685_s11, 256  ;;  %p2335_p13 = scmp.lt.s32.totalorder %s1685_s11, %s1685_s11 }
 0x218   :  { %p2331_p12 = scmp.ne.s32.totalorder %s1685_s11, %s2330_s12  ;;  %p2336_p0 = scmp.lt.s32.totalorder %s2330_s12, %s2330_s12 }
 0x219   :  { %1386 = vmatpush1.bf16.msra.mxu1 %v2148_v57  ;;  %v1199_v57 = vrot.slane %v1190_v55, %v2496_v26 }
 0x21a   :  { %1387 = vmatprep.subr.bf16.mxu1 %v2153_v58  ;;  %p2337_p1 = por %p2336_p0, %p2335_p13 }
 0x21c   :  { %p2338_p2 = pnand %p2337_p1, %p2331_p12 }
 0x21d   :  { %1388 = vmatpush1.bf16.msra.mxu1 %v2151_v59 }
 0x21e   :  { %1389 = vmatprep.subr.bf16.mxu1 %v2156_v60 }
 0x221   :  { %1390 = vmatpush1.bf16.msra.mxu1 %v2154_v61 }
 0x222   :  { %1391 = vmatprep.subr.bf16.mxu1 %v2159_v62 }
 0x225   :  { %1392 = vmatpush1.bf16.msra.mxu1 %v2157_v63 }
 0x226   :  { %1393 = vmatprep.subr.bf16.mxu1 %v2162_v0 }
 0x229   :  { %1394 = vmatpush1.bf16.msra.mxu1 %v2160_v1 }
 0x22a   :  { %1395 = vmatprep.subr.bf16.mxu1 %v2165_v2 }
 0x22d   :  { %1396 = vmatpush1.bf16.msra.mxu1 %v2163_v3 }
 0x22e   :  { %1397 = vmatprep.subr.bf16.mxu1 %v2168_v4  ;;  %v1454_v4 = vld [vmem:[%s2535_s8] sm:$0x3] }
 0x231   :  { %1398 = vmatpush1.bf16.msra.mxu1 %v2166_v5  ;;  %v1459_v5 = vrot.slane %v1454_v4, %v2491_v24 }
 0x232   :  { %1399 = vmatprep.subr.bf16.mxu1 %v2171_v6  ;;  %v1463_v6 = vrot.slane %v1454_v4, %v2496_v26 }
 0x235   :  { %1400 = vmatpush1.bf16.msra.mxu1 %v2169_v7 }
 0x236   :  { %1633 = vmatprep.subr.bf16.mxu1 %v2174_v8 }
 0x2cb   :  { %v1139_v12 = vpop.f32.mrb[4].mxu1 }
 0x2cc   :  { %v1140_v13 = vadd.f32 %v1139_v12, %v931_v10  ;;  %v1141_v14 = vpop.f32.mrb[5].mxu1 }
 0x2cd   :  { %v1142_v15 = vadd.f32 %v1141_v14, %v935_v11  ;;  %v1143_v16 = vpop.f32.mrb[6].mxu1 }
 0x2ce   :  { %v1146_v17 = vmax.f32 %v1140_v13, 0.0  ;;  %v1144_v18 = vpop.f32.mrb[7].mxu1 }
 0x2cf   :  { %v1147_v19 = vmax.f32 %v1142_v15, 0.0 }
 0x2d0   :  { %v1904_v22 = vpack.c.bf16 %v1146_v17, %v1146_v17 }
 0x2d1   :  { %v1905_v20 = vpack.c.bf16 %v1147_v19, %v1147_v19 }
 0x2d3   :  { %1401 = vmatprep.mubr.bf16.mxu1 %v1905_v20 }
 0x2d4   :  { %1402 = vmatmul.mubr.bf16.vlgmr.msra.gmra.mrb[8].mxu1 %v1904_v22 }
 0x2d5   :  { %1634 = vmatpush1.bf16.msra.mxu1 %v2172_v21 }
 0x2d6   :  { %1635 = vmatprep.subr.bf16.mxu1 %v2177_v23 }
 0x2d9   :  { %1636 = vmatpush1.bf16.msra.mxu1 %v2175_v25 }
 0x2da   :  { %1637 = vmatprep.subr.bf16.mxu1 %v2180_v27 }
 0x2dd   :  { %1638 = vmatpush1.bf16.msra.mxu1 %v2178_v28 }
 0x2de   :  { %1639 = vmatprep.subr.bf16.mxu1 %v2183_v29 }
 0x2e1   :  { %1640 = vmatpush1.bf16.msra.mxu1 %v2181_v30 }
 0x2e2   :  { %1641 = vmatprep.subr.bf16.mxu1 %v2186_v31 }
 0x2e5   :  { %1642 = vmatpush1.bf16.msra.mxu1 %v2184_v32 }
 0x2e6   :  { %1643 = vmatprep.subr.bf16.mxu1 %v2189_v33 }
 0x2e9   :  { %1644 = vmatpush1.bf16.msra.mxu1 %v2187_v34 }
 0x2ea   :  { %1645 = vmatprep.subr.bf16.mxu1 %v2192_v35 }
 0x2ed   :  { %1646 = vmatpush1.bf16.msra.mxu1 %v2190_v36 }
 0x2ee   :  { %1647 = vmatprep.subr.bf16.mxu1 %v2195_v37 }
 0x2f1   :  { %1648 = vmatpush1.bf16.msra.mxu1 %v2193_v38 }
 0x2f2   :  { %1649 = vmatprep.subr.bf16.mxu1 %v2198_v39 }
 0x2f5   :  { %1650 = vmatpush1.bf16.msra.mxu1 %v2196_v40 }
 0x2f6   :  { %1651 = vmatprep.subr.bf16.mxu1 %v2201_v41 }
 0x2f9   :  { %1652 = vmatpush1.bf16.msra.mxu1 %v2199_v42 }
 0x2fa   :  { %1653 = vmatprep.subr.bf16.mxu1 %v2204_v43 }
 0x2fd   :  { %1654 = vmatpush1.bf16.msra.mxu1 %v2202_v44 }
 0x2fe   :  { %1655 = vmatprep.subr.bf16.mxu1 %v2207_v45 }
 0x301   :  { %1656 = vmatpush1.bf16.msra.mxu1 %v2205_v46 }
 0x302   :  { %1657 = vmatprep.subr.bf16.mxu1 %v2210_v47 }
 0x305   :  { %1658 = vmatpush1.bf16.msra.mxu1 %v2208_v48 }
 0x306   :  { %1659 = vmatprep.subr.bf16.mxu1 %v2213_v49 }
 0x309   :  { %1660 = vmatpush1.bf16.msra.mxu1 %v2211_v50 }
 0x30a   :  { %1661 = vmatprep.subr.bf16.mxu1 %v2216_v51 }
 0x30d   :  { %1662 = vmatpush1.bf16.msra.mxu1 %v2214_v52 }
 0x30e   :  { %1663 = vmatprep.subr.bf16.mxu1 %v2219_v53 }
 0x311   :  { %1664 = vmatpush1.bf16.msra.mxu1 %v2217_v54 }
 0x3a7   :  { %v1403_v58 = vpop.f32.mrb[8].mxu1 }
 0x3a8   :  { %v1404_v59 = vadd.f32 %v1403_v58, %v1195_v56  ;;  %v1405_v60 = vpop.f32.mrb[9].mxu1 }
 0x3a9   :  { %v1406_v61 = vadd.f32 %v1405_v60, %v1199_v57  ;;  %v1407_v62 = vpop.f32.mrb[10].mxu1 }
 0x3aa   :  { %v1410_v63 = vmax.f32 %v1404_v59, 0.0  ;;  %v1408_v0 = vpop.f32.mrb[11].mxu1 }
 0x3ab   :  { %v1411_v1 = vmax.f32 %v1406_v61, 0.0 }
 0x3ac   :  { %v1906_v3 = vpack.c.bf16 %v1410_v63, %v1410_v63 }
 0x3ad   :  { %v1907_v2 = vpack.c.bf16 %v1411_v1, %v1411_v1 }
 0x3af   :  { %1665 = vmatprep.mubr.bf16.mxu1 %v1907_v2 }
 0x3b0   :  { %1666 = vmatmul.mubr.bf16.vlgmr.msra.gmra.mrb[12].mxu1 %v1906_v3 }
 0x483   :  { %v1667_v7 = vpop.f32.mrb[12].mxu1 }
 0x484   :  { %v1668_v8 = vadd.f32 %v1667_v7, %v1459_v5  ;;  %v1669_v9 = vpop.f32.mrb[13].mxu1 }
 0x485   :  { %v1670_v10 = vadd.f32 %v1669_v9, %v1463_v6  ;;  %v1671_v11 = vpop.f32.mrb[14].mxu1 }
 0x486   :  { %v1674_v12 = vmax.f32 %v1668_v8, 0.0  ;;  %v1672_v13 = vpop.f32.mrb[15].mxu1 }
 0x487   :  { %v1675_v14 = vmax.f32 %v1670_v10, 0.0 }
 0x488   :  { %1676 = vst [vmem:[#allocation12] sm:$0xff] %v1674_v12 }
 0x489   :  { %1677 = vst [vmem:[#allocation12 + $0x8] sm:$0xff] %v1675_v14 }
 0x48a   :  { %2341 = shalt.err (!%p2338_p2)
}
 0x48b   :  { %s2342_s1 = scalar_lea.hbm %s2536_s9, 256 }
 0x48c   :  { %p2343_p3 = scmp.ne.s32.totalorder %s2536_s9, %s2342_s1  ;;  %p2346_p4 = scmp.lt.u32.totalorder %s2342_s1, %s2536_s9 }
 0x48e   :  { %p2348_p5 = pnand %p2346_p4, %p2343_p3 }
 0x490   :  { %2351 = shalt.err (!%p2348_p5)
}
 0x491   :  { %1687 = dma.vmem_to_hbm [thread:$0]  %s1685_s11, 256, %s2536_s9, [#allocation5]  }
 0x492   :  { %2358 = dma.done.wait [#allocation5], 256  }
 0x493   :  { %2359 = vsyncadd [#allocation5], 4294967040 }
 0x494   :  { %1691 = vsyncpa [#allocation4], 1 }
 0x495   :  { %1692 = vsyncpa [#allocation7], 1 }
 0x496   :  { %1693 = vsyncpa [#allocation10], 1 }
 0x497   :  { %1694 = vsyncpa [#allocation5], 1 }

</bundles_post_ra>
